<compile_context>
chip_gen: v5e
topology: v5e:2x2
jax: 0.10.0
libtpu: 0.0.40
codegen_flags: <defaults>
</compile_context>

<pallas_src>
import jax
import jax.numpy as jnp
from jax.experimental import pallas as pl
from jax.experimental.pallas import tpu as pltpu

# ---- small synthetic config (ViT-style: in_features = 4 * hidden) ----
B = 2                 # batch
S = 8                 # tokens
IN_FEATURES = 512     # intermediate size
OUT_FEATURES = 128    # hidden size (multiple of 128 -> unmasked vst)
DROPOUT_PROB = 0.1    # identity at inference
DTYPE = jnp.float32
MATMUL_DTYPE = jnp.bfloat16   # MXU operand dtype (f32 accumulation preserved)


def _round_up(x, m):
    return ((x + m - 1) // m) * m


# ------------------------------------------------------------------ kernel
def vit_output_kernel(x_ref, w_ref, b_ref, res_ref, o_ref, acc_ref):
    """o = dense(x) + residual, fused.  K-tiled matmul into an f32 accumulator."""
    k = pl.program_id(1)

    @pl.when(k == 0)
    def _init():
        acc_ref[...] = jnp.zeros_like(acc_ref)

    # x tile cast to bf16 (operand only); weight arrives already bf16 from HBM.
    acc_ref[...] += jnp.dot(
        x_ref[...].astype(MATMUL_DTYPE),
        w_ref[...],
        preferred_element_type=jnp.float32,
    )

    @pl.when(k == pl.num_programs(1) - 1)
    def _finalize():
        # dropout == identity (eval); bias + residual add in f32, one lane-dense store
        o_ref[...] = (acc_ref[...] + b_ref[...] + res_ref[...]).astype(o_ref.dtype)


# ------------------------------------------------------------------ wrapper
def vit_output(hidden_states, input_tensor, weight, bias, *, tile_m=512, tile_k=512):
    """hidden_states: [B, S, K], input_tensor: [B, S, N], weight: [K, N], bias: [N]."""
    Bh, Sh, K = hidden_states.shape
    N = weight.shape[1]
    M = Bh * Sh

    x2 = hidden_states.reshape(M, K)
    r2 = input_tensor.reshape(M, N)
    b2 = bias.reshape(1, N).astype(jnp.float32)
    w2 = weight.astype(MATMUL_DTYPE)          # pre-cast once in HBM (half the DMA bytes)

    # ---- row tiling: pad M so the grid is exact and stores stay unmasked ----
    if M >= tile_m:
        tm = tile_m                           # multiple of 256 -> full MXU rows
        m_pad = _round_up(M, tm)
    else:
        tm = _round_up(M, 8)                  # at least full sublanes
        m_pad = tm

    # ---- K tiling: trailing "arbitrary" axis, accumulate in f32 scratch ----
    if K > tile_k:
        tk = tile_k
        k_pad = _round_up(K, tk)
    else:
        tk = K
        k_pad = K

    if m_pad != M or k_pad != K:
        x2 = jnp.pad(x2, ((0, m_pad - M), (0, k_pad - K)))
    if m_pad != M:
        r2 = jnp.pad(r2, ((0, m_pad - M), (0, 0)))
    if k_pad != K:
        w2 = jnp.pad(w2, ((0, k_pad - K), (0, 0)))

    grid = (m_pad // tm, k_pad // tk)

    out = pl.pallas_call(
        vit_output_kernel,
        out_shape=jax.ShapeDtypeStruct((m_pad, N), hidden_states.dtype),
        grid_spec=pltpu.PrefetchScalarGridSpec(
            num_scalar_prefetch=0,
            grid=grid,
            in_specs=[
                pl.BlockSpec((tm, tk), lambda i, k: (i, k)),   # activations
                pl.BlockSpec((tk, N), lambda i, k: (k, 0)),    # weight (bf16)
                pl.BlockSpec((1, N), lambda i, k: (0, 0)),     # bias (resident)
                pl.BlockSpec((tm, N), lambda i, k: (i, 0)),    # residual
            ],
            out_specs=pl.BlockSpec((tm, N), lambda i, k: (i, 0)),
            scratch_shapes=[pltpu.VMEM((tm, N), jnp.float32)],  # f32 accumulator
        ),
        compiler_params=pltpu.CompilerParams(
            dimension_semantics=("parallel", "arbitrary"),
            vmem_limit_bytes=32 * 1024 * 1024,
        ),
    )(x2, w2, b2, r2)

    return out[:M].reshape(Bh, Sh, N)


# ------------------------------------------------------------------ main
if __name__ == "__main__":
    key = jax.random.PRNGKey(0)
    kx, kr, kw, kb = jax.random.split(key, 4)

    hidden_states = jax.random.normal(kx, (B, S, IN_FEATURES), dtype=DTYPE)
    input_tensor = jax.random.normal(kr, (B, S, OUT_FEATURES), dtype=DTYPE)
    weight = (0.02 * jax.random.normal(kw, (IN_FEATURES, OUT_FEATURES))).astype(DTYPE)
    bias = (0.02 * jax.random.normal(kb, (OUT_FEATURES,))).astype(DTYPE)

    out = vit_output(hidden_states, input_tensor, weight, bias)
    jax.block_until_ready(out)

    # pure-JAX reference (f32 matmul); loose tolerance for bf16 MXU operands
    ref = jnp.einsum("bsk,kn->bsn", hidden_states, weight) + bias + input_tensor
    assert out.shape == (B, S, OUT_FEATURES)
    assert bool(jnp.all(jnp.isfinite(out)))
    assert bool(jnp.allclose(out, ref, atol=5e-2, rtol=5e-2))

    # Unaligned token count (ViT-style) -> exercises row padding / output slicing.
    S2 = 5
    hs2 = jax.random.normal(kx, (1, S2, IN_FEATURES), dtype=DTYPE)
    res2 = jax.random.normal(kr, (1, S2, OUT_FEATURES), dtype=DTYPE)
    out2 = vit_output(hs2, res2, weight, bias)
    jax.block_until_ready(out2)
    ref2 = jnp.einsum("bsk,kn->bsn", hs2, weight) + bias + res2
    assert out2.shape == (1, S2, OUT_FEATURES)
    assert bool(jnp.allclose(out2, ref2, atol=5e-2, rtol=5e-2))

    print("KERNEL_OK")
</pallas_src>

<mosaic_0001>
module attributes {stable_mosaic.version = 11 : i64} {
  func.func @vit_output_kernel(%arg0: i32, %arg1: i32, %arg2: memref<16x512xf32, #tpu.memory_space<vmem>>, %arg3: memref<512x128xbf16, #tpu.memory_space<vmem>>, %arg4: memref<1x128xf32, #tpu.memory_space<vmem>>, %arg5: memref<16x128xf32, #tpu.memory_space<vmem>>, %arg6: memref<16x128xf32, #tpu.memory_space<vmem>>, %arg7: memref<16x128xf32, #tpu.memory_space<vmem>>) attributes {dimension_semantics = [#tpu.dimension_semantics<parallel>, #tpu.dimension_semantics<arbitrary>], iteration_bounds = array<i64: 1, 1>, scalar_prefetch = 0 : i64, scratch_operands = 1 : i64, tpu.core_type = #tpu.core_type<tc>, window_params = [{transform_indices = @transform_0, window_bounds = array<i64: 16, 512>}, {transform_indices = @transform_1, window_bounds = array<i64: 512, 128>}, {pipeline_mode = #tpu.pipeline_mode<synchronous>, transform_indices = @transform_2, window_bounds = array<i64: 1, 128>}, {transform_indices = @transform_3, window_bounds = array<i64: 16, 128>}, {transform_indices = @transform_4, window_bounds = array<i64: 16, 128>}]} {
    %c0_i32 = arith.constant 0 : i32
    %0 = arith.cmpi eq, %arg1, %c0_i32 : i32
    %1 = arith.extui %0 : i1 to i32
    %c0_i32_0 = arith.constant 0 : i32
    %2 = arith.cmpi ne, %1, %c0_i32_0 : i32
    scf.if %2 {
      %cst_10 = arith.constant 0.000000e+00 : f32
      %13 = vector.broadcast %cst_10 : f32 to vector<16x128xf32>
      %c0_11 = arith.constant 0 : index
      %c0_12 = arith.constant 0 : index
      %14 = vector.load %arg7[%c0_11, %c0_12] : memref<16x128xf32, #tpu.memory_space<vmem>>, vector<16x128xf32>
      tpu.vector_store %arg7[%c0_11, %c0_12], %13 {strides = array<i32>} : memref<16x128xf32, #tpu.memory_space<vmem>>, vector<16x128xf32>,
    } else {
    }
    %c0 = arith.constant 0 : index
    %c0_1 = arith.constant 0 : index
    %3 = vector.load %arg7[%c0, %c0_1] : memref<16x128xf32, #tpu.memory_space<vmem>>, vector<16x128xf32>
    %c0_2 = arith.constant 0 : index
    %c0_3 = arith.constant 0 : index
    %4 = vector.load %arg2[%c0_2, %c0_3] : memref<16x512xf32, #tpu.memory_space<vmem>>, vector<16x512xf32>
    %5 = arith.truncf %4 : vector<16x512xf32> to vector<16x512xbf16>
    %c0_4 = arith.constant 0 : index
    %c0_5 = arith.constant 0 : index
    %6 = vector.load %arg3[%c0_4, %c0_5] : memref<512x128xbf16, #tpu.memory_space<vmem>>, vector<512x128xbf16>
    %cst = arith.constant dense<0.000000e+00> : vector<16x128xf32>
    %7 = tpu.matmul %5, %6, %cst {dimension_numbers = #tpu.dot_dimension_numbers<[1], [0], [0], [1], [0, 0, 1, 1], [], []>} : vector<16x512xbf16>, vector<512x128xbf16>, vector<16x128xf32> -> vector<16x128xf32>
    %8 = arith.addf %3, %7 : vector<16x128xf32>
    %c0_6 = arith.constant 0 : index
    %c0_7 = arith.constant 0 : index
    %9 = vector.load %arg7[%c0_6, %c0_7] : memref<16x128xf32, #tpu.memory_space<vmem>>, vector<16x128xf32>
    tpu.vector_store %arg7[%c0_6, %c0_7], %8 {strides = array<i32>} : memref<16x128xf32, #tpu.memory_space<vmem>>, vector<16x128xf32>,
    %c0_i32_8 = arith.constant 0 : i32
    %10 = arith.cmpi eq, %arg1, %c0_i32_8 : i32
    %11 = arith.extui %10 : i1 to i32
    %c0_i32_9 = arith.constant 0 : i32
    %12 = arith.cmpi ne, %11, %c0_i32_9 : i32
    scf.if %12 {
      %c0_10 = arith.constant 0 : index
      %c0_11 = arith.constant 0 : index
      %13 = vector.load %arg7[%c0_10, %c0_11] : memref<16x128xf32, #tpu.memory_space<vmem>>, vector<16x128xf32>
      %c0_12 = arith.constant 0 : index
      %c0_13 = arith.constant 0 : index
      %14 = vector.load %arg4[%c0_12, %c0_13] : memref<1x128xf32, #tpu.memory_space<vmem>>, vector<1x128xf32>
      %15 = vector.broadcast %14 : vector<1x128xf32> to vector<16x128xf32>
      %16 = arith.addf %13, %15 : vector<16x128xf32>
      %c0_14 = arith.constant 0 : index
      %c0_15 = arith.constant 0 : index
      %17 = vector.load %arg5[%c0_14, %c0_15] : memref<16x128xf32, #tpu.memory_space<vmem>>, vector<16x128xf32>
      %18 = arith.addf %16, %17 : vector<16x128xf32>
      %c0_16 = arith.constant 0 : index
      %c0_17 = arith.constant 0 : index
      %19 = vector.load %arg6[%c0_16, %c0_17] : memref<16x128xf32, #tpu.memory_space<vmem>>, vector<16x128xf32>
      tpu.vector_store %arg6[%c0_16, %c0_17], %18 {strides = array<i32>} : memref<16x128xf32, #tpu.memory_space<vmem>>, vector<16x128xf32>,
    } else {
    }
    return
  }
  func.func @transform_0(%arg0: i32, %arg1: i32) -> (i32, i32) {
    %c0_i32 = arith.constant 0 : i32
    return %arg0, %arg1 : i32, i32
  }
  func.func @transform_1(%arg0: i32, %arg1: i32) -> (i32, i32) {
    %c0_i32 = arith.constant 0 : i32
    %c0_i32_0 = arith.constant 0 : i32
    return %arg1, %c0_i32 : i32, i32
  }
  func.func @transform_2(%arg0: i32, %arg1: i32) -> (i32, i32) {
    %c0_i32 = arith.constant 0 : i32
    %c0_i32_0 = arith.constant 0 : i32
    %c0_i32_1 = arith.constant 0 : i32
    return %c0_i32, %c0_i32_0 : i32, i32
  }
  func.func @transform_3(%arg0: i32, %arg1: i32) -> (i32, i32) {
    %c0_i32 = arith.constant 0 : i32
    %c0_i32_0 = arith.constant 0 : i32
    return %arg0, %c0_i32 : i32, i32
  }
  func.func @transform_4(%arg0: i32, %arg1: i32) -> (i32, i32) {
    %c0_i32 = arith.constant 0 : i32
    %c0_i32_0 = arith.constant 0 : i32
    return %arg0, %c0_i32 : i32, i32
  }
}

</mosaic_0001>

<bundles_post_ra>
// kernel: tpu_custom_call.1
= control target key start
LH: loop header
LB: loop body
LE: loop exit
PB: predicated region body
PF: predicated region fallthrough
CT: control target
= control target key end

     0   :  { %9 = vsyncpa [#allocation4], 0  ;;  %s767_s0 = inlined_call_operand.hbm [shape: f32[16,512], index: 0, kind: input, shape index: {}]   ;;  %s768_s1 = inlined_call_operand.hbm [shape: bf16[512,128], index: 1, kind: input, shape index: {}]   ;;  %s769_s2 = inlined_call_operand.vmem [shape: f32[1,128], index: 2, kind: input, shape index: {}]   ;;  %s770_s3 = inlined_call_operand.hbm [shape: f32[16,128], index: 3, kind: input, shape index: {}]   ;;  %s771_s4 = inlined_call_operand.hbm [shape: f32[16,128], index: 4, kind: output, shape index: {}]  }
   0x1   :  { %10 = vsyncpa [#allocation7], 0  ;;  %s29_s17 = sshll.u32 %s768_s1, 4  ;;  %s30_s17 = int_to_ptr.hbm [resolvable:$true] %s29_s17 }
   0x2   :  { %11 = vsyncpa [#allocation5], 0  ;;  %s711_s18 = smov [#allocation6]   ;;  %s16_s22 = sshll.u32 %s767_s0, 4  ;;  %s17_s22 = int_to_ptr.hbm [resolvable:$true] %s16_s22 }
   0x3   :  { %s31_s19 = sshll.u32 %s711_s18, 4  ;;  %s712_s23 = smov 64   ;;  %s32_s19 = int_to_ptr.vmem [resolvable:$true] %s31_s19 }
   0x4   :  { %s713_s24 = smov 4   ;;  %s714_s25 = smov [#allocation3]  }
   0x5   :  { %37 = dma.hbm_to_vmem [thread:$0]  %s30_s17, 4096, %s32_s19, [#allocation7], %s712_s23, %s712_s23, %s713_s24  }
   0x6   :  { %s18_s26 = sshll.u32 %s714_s25, 4  ;;  %s715_s27 = smov 512   ;;  %s19_s26 = int_to_ptr.vmem [resolvable:$true] %s18_s26 }
   0x7   :  { %s716_s28 = smov 32   ;;  %s44_s30 = sshll.u32 %s770_s3, 4  ;;  %s45_s30 = int_to_ptr.hbm [resolvable:$true] %s44_s30 }
   0x8   :  { %24 = dma.hbm_to_vmem [thread:$0]  %s17_s22, 1024, %s19_s26, [#allocation4], %s715_s27, %s715_s27, %s716_s28  }
   0x9   :  { %s717_s5 = smov [#allocation8]   ;;  %s718_s7 = smov 128  }
   0xa   :  { %s46_s6 = sshll.u32 %s717_s5, 4  ;;  %s719_s0 = smov 8   ;;  %s47_s6 = int_to_ptr.vmem [resolvable:$true] %s46_s6 }
   0xb   :  { %52 = dma.hbm_to_vmem [thread:$0]  %s45_s30, 256, %s47_s6, [#allocation7], %s718_s7, %s718_s7, %s719_s0  }
   0xc   :  { %705 = dma.done.wait [#allocation4], 1024  }
   0xd   :  { %706 = vsyncadd [#allocation4], 4294966272 }
   0xe   :  { %707 = dma.done.wait [#allocation7], 4352  }
   0xf   :  { %708 = vsyncadd [#allocation7], 4294962944  ;;  %v573_v0 = vld [vmem:[#allocation6 + $0x38] sm:$0xff]  ;;  %v572_v4 = vld [vmem:[#allocation6 + $0x30] sm:$0xff]  ;;  %s720_s9 = smov [#allocation9]   ;;  %s424_s13 = sshll.u32 %s771_s4, 4  ;;  %s425_s13 = int_to_ptr.hbm [resolvable:$true] %s424_s13 }
  0x10   :  { %v581_v1 = vld [vmem:[#allocation6 + $0x78] sm:$0xff]  ;;  %341 = vmatpush.bf16.msra.mxu0 %v573_v0  ;;  %v580_v5 = vld [vmem:[#allocation6 + $0x70] sm:$0xff]  ;;  %v571_v8 = vld [vmem:[#allocation6 + $0x28] sm:$0xff]  ;;  %s422_s10 = sshll.u32 %s720_s9, 4  ;;  %s423_s10 = int_to_ptr.vmem [resolvable:$true] %s422_s10 }
  0x11   :  { %v589_v2 = vld [vmem:[#allocation6 + $0xb8] sm:$0xff]  ;;  %355 = vmatpush.bf16.msra.mxu1 %v581_v1  ;;  %v588_v6 = vld [vmem:[#allocation6 + $0xb0] sm:$0xff]  ;;  %v579_v9 = vld [vmem:[#allocation6 + $0x68] sm:$0xff] }
  0x12   :  { %v597_v3 = vld [vmem:[#allocation6 + $0xf8] sm:$0xff]  ;;  %369 = vmatpush.bf16.msra.mxu2 %v589_v2  ;;  %v596_v7 = vld [vmem:[#allocation6 + $0xf0] sm:$0xff]  ;;  %v587_v10 = vld [vmem:[#allocation6 + $0xa8] sm:$0xff] }
  0x13   :  { %383 = vmatpush.bf16.msra.mxu3 %v597_v3  ;;  %v595_v11 = vld [vmem:[#allocation6 + $0xe8] sm:$0xff]  ;;  %v570_v12 = vld [vmem:[#allocation6 + $0x20] sm:$0xff]  ;;  %v569_v16 = vld [vmem:[#allocation6 + $0x18] sm:$0xff] }
  0x14   :  { %342 = vmatpush.bf16.msra.mxu0 %v572_v4  ;;  %v578_v13 = vld [vmem:[#allocation6 + $0x60] sm:$0xff]  ;;  %v577_v17 = vld [vmem:[#allocation6 + $0x58] sm:$0xff]  ;;  %v568_v20 = vld [vmem:[#allocation6 + $0x10] sm:$0xff] }
  0x15   :  { %356 = vmatpush.bf16.msra.mxu1 %v580_v5  ;;  %v586_v14 = vld [vmem:[#allocation6 + $0xa0] sm:$0xff]  ;;  %v585_v18 = vld [vmem:[#allocation6 + $0x98] sm:$0xff]  ;;  %v576_v21 = vld [vmem:[#allocation6 + $0x50] sm:$0xff] }
  0x16   :  { %370 = vmatpush.bf16.msra.mxu2 %v588_v6  ;;  %v594_v15 = vld [vmem:[#allocation6 + $0xe0] sm:$0xff]  ;;  %v593_v19 = vld [vmem:[#allocation6 + $0xd8] sm:$0xff]  ;;  %v584_v22 = vld [vmem:[#allocation6 + $0x90] sm:$0xff] }
  0x17   :  { %384 = vmatpush.bf16.msra.mxu3 %v596_v7  ;;  %v592_v23 = vld [vmem:[#allocation6 + $0xd0] sm:$0xff]  ;;  %v567_v24 = vld [vmem:[#allocation6 + $0x8] sm:$0xff]  ;;  %v566_v28 = vld [vmem:[#allocation6] sm:$0xff] }
  0x18   :  { %343 = vmatpush.bf16.msra.mxu0 %v571_v8  ;;  %v575_v25 = vld [vmem:[#allocation6 + $0x48] sm:$0xff]  ;;  %v574_v29 = vld [vmem:[#allocation6 + $0x40] sm:$0xff]  ;;  %v75_v36 = vld [vmem:[#allocation3 + $0x10] sm:$0xff] }
  0x19   :  { %357 = vmatpush.bf16.msra.mxu1 %v579_v9  ;;  %v583_v26 = vld [vmem:[#allocation6 + $0x88] sm:$0xff]  ;;  %v582_v30 = vld [vmem:[#allocation6 + $0x80] sm:$0xff]  ;;  %v79_v37 = vld [vmem:[#allocation3 + $0x30] sm:$0xff] }
  0x1a   :  { %371 = vmatpush.bf16.msra.mxu2 %v587_v10  ;;  %v591_v27 = vld [vmem:[#allocation6 + $0xc8] sm:$0xff]  ;;  %v590_v31 = vld [vmem:[#allocation6 + $0xc0] sm:$0xff]  ;;  %v76_v38 = vld [vmem:[#allocation3 + $0x18] sm:$0xff]  ;;  %v83_v42 = vpack.c.bf16 %v79_v37, %v75_v36 }
  0x1b   :  { %385 = vmatpush.bf16.msra.mxu3 %v595_v11  ;;  %v73_v32 = vld [vmem:[#allocation3] sm:$0xff]  ;;  %v74_v34 = vld [vmem:[#allocation3 + $0x8] sm:$0xff]  ;;  %v80_v39 = vld [vmem:[#allocation3 + $0x38] sm:$0xff] }
  0x1c   :  { %344 = vmatpush.bf16.msra.mxu0 %v570_v12  ;;  %v77_v33 = vld [vmem:[#allocation3 + $0x20] sm:$0xff]  ;;  %v78_v35 = vld [vmem:[#allocation3 + $0x28] sm:$0xff]  ;;  %v84_v43 = vpack.c.bf16 %v80_v39, %v76_v38 }
  0x1d   :  { %358 = vmatpush.bf16.msra.mxu1 %v578_v13  ;;  %v81_v40 = vpack.c.bf16 %v77_v33, %v73_v32  ;;  %v82_v41 = vpack.c.bf16 %v78_v35, %v74_v34  ;;  %v608_v50 = vld [vmem:[%s769_s2] ss:$0 sm:$0xff]  ;;  %v413_v62 = vld [vmem:[#allocation8 + $0x8] sm:$0xff] }
  0x1e   :  { %372 = vmatpush.bf16.msra.mxu2 %v586_v14  ;;  %v412_v52 = vld [vmem:[#allocation8] sm:$0xff] }
  0x1f   :  { %386 = vmatpush.bf16.msra.mxu3 %v594_v15 }
  0x20   :  { %345 = vmatpush.bf16.msra.mxu0 %v569_v16 }
  0x21   :  { %359 = vmatpush.bf16.msra.mxu1 %v577_v17 }
  0x22   :  { %373 = vmatpush.bf16.msra.mxu2 %v585_v18 }
  0x23   :  { %387 = vmatpush.bf16.msra.mxu3 %v593_v19 }
  0x24   :  { %346 = vmatpush.bf16.msra.mxu0 %v568_v20 }
  0x25   :  { %360 = vmatpush.bf16.msra.mxu1 %v576_v21 }
  0x26   :  { %374 = vmatpush.bf16.msra.mxu2 %v584_v22 }
  0x27   :  { %388 = vmatpush.bf16.msra.mxu3 %v592_v23 }
  0x28   :  { %347 = vmatpush.bf16.msra.mxu0 %v567_v24 }
  0x29   :  { %361 = vmatpush.bf16.msra.mxu1 %v575_v25 }
  0x2a   :  { %375 = vmatpush.bf16.msra.mxu2 %v583_v26 }
  0x2b   :  { %389 = vmatpush.bf16.msra.mxu3 %v591_v27 }
  0x2c   :  { %348 = vmatpush.bf16.msra.mxu0 %v566_v28 }
  0x2d   :  { %362 = vmatpush.bf16.msra.mxu1 %v574_v29 }
  0x2e   :  { %376 = vmatpush.bf16.msra.mxu2 %v582_v30 }
  0x2f   :  { %390 = vmatpush.bf16.msra.mxu3 %v590_v31  ;;  %349 = vmatmul.bf16.vlgmr.msra.gmra.mxu0 %v81_v40 }
  0x30   :  { %363 = vmatmul.bf16.vlgmr.msra.gmra.mxu1 %v82_v41 }
  0x31   :  { %377 = vmatmul.bf16.vlgmr.msra.gmra.mxu2 %v83_v42 }
  0x32   :  { %391 = vmatmul.bf16.vlgmr.msra.gmra.mxu3 %v84_v43 }
  0xac   :  { %v350_v44 = vpop.f32.mrf.mxu0 }
  0xad   :  { %v364_v45 = vpop.f32.mrf.mxu1 }
  0xae   :  { %v365_v46 = vadd.f32 %v364_v45, %v350_v44 }
  0xb4   :  { %v378_v47 = vpop.f32.mrf.mxu2  ;;  %v352_v53 = vpop.f32.mrf.mxu0 }
  0xb5   :  { %v392_v48 = vpop.f32.mrf.mxu3  ;;  %v379_v49 = vadd.f32 %v378_v47, %v365_v46  ;;  %v366_v54 = vpop.f32.mrf.mxu1 }
  0xb6   :  { %v367_v57 = vadd.f32 %v366_v54, %v352_v53 }
  0xb7   :  { %v393_v51 = vadd.f32 %v392_v48, %v379_v49 }
  0xb9   :  { %v410_v55 = vadd.f32 %v608_v50, %v393_v51 }
  0xbb   :  { %v414_v56 = vadd.f32 %v412_v52, %v410_v55 }
  0xbc   :  { %v380_v58 = vpop.f32.mrf.mxu2 }
  0xbd   :  { %416 = vst [vmem:[#allocation9] sm:$0xff] %v414_v56  ;;  %v381_v59 = vadd.f32 %v380_v58, %v367_v57  ;;  %v394_v60 = vpop.f32.mrf.mxu3 }
  0xbf   :  { %v395_v61 = vadd.f32 %v394_v60, %v381_v59 }
  0xc1   :  { %v411_v63 = vadd.f32 %v608_v50, %v395_v61 }
  0xc3   :  { %v415_v0 = vadd.f32 %v413_v62, %v411_v63 }
  0xc5   :  { %417 = vst [vmem:[#allocation9 + $0x8] sm:$0xff] %v415_v0 }
  0xc6   :  { %430 = dma.vmem_to_hbm [thread:$0]  %s423_s10, 256, %s425_s13, [#allocation5], %s718_s7, %s718_s7, %s719_s0  }
  0xc7   :  { %709 = dma.done.wait [#allocation5], 256  }
  0xc8   :  { %710 = vsyncadd [#allocation5], 4294967040 }
  0xc9   :  { %435 = vsyncpa [#allocation4], 1 }
  0xca   :  { %436 = vsyncpa [#allocation7], 1 }
  0xcb   :  { %437 = vsyncpa [#allocation5], 1 }

</bundles_post_ra>
